<compile_context>
chip_gen: v7x
topology: tpu7x:2x2x1
jax: 0.10.0
libtpu: 0.0.40
codegen_flags: <defaults>
</compile_context>

<pallas_src>
import jax
import jax.numpy as jnp
import numpy as np
from jax.experimental import pallas as pl
from jax.experimental.pallas import tpu as pltpu


def hsc_kernel(xp_ref, w_ref, o_ref, slab_ref):
    """One (batch, row-block) grid step.

    xp_ref:   (1, H+2, W+2, Cin)  zero-padded image (resident across row blocks)
    w_ref:    (9*Cin, Cout_p)     im2col weight, 1x1 conv folded into centre tap
    o_ref:    (1, TH*W, Cout_p)   flat output rows for this row block
    slab_ref: (TH*W, 9*Cin)       VMEM im2col scratch
    """
    j = pl.program_id(1)
    Cin = xp_ref.shape[3]
    W = xp_ref.shape[2] - 2
    TH = o_ref.shape[1] // W
    r0 = j * TH

    # Build the im2col slab once: the 9 shifted (TH, W, Cin) windows become
    # consecutive column groups -> fused contraction dim of 9*Cin.
    for ky in range(3):
        for kx in range(3):
            t = ky * 3 + kx
            patch = xp_ref[0, pl.ds(r0 + ky, TH), pl.ds(kx, W), :]
            slab_ref[:, t * Cin:(t + 1) * Cin] = patch.reshape(TH * W, Cin)

    # Single MXU matmul with f32 accumulation; lane-dense (Cout_p % 128 == 0)
    # unmasked store.
    o_ref[0] = jnp.dot(
        slab_ref[...], w_ref[...],
        preferred_element_type=jnp.float32).astype(o_ref.dtype)


def _pick_row_tile(H, W, target_rows=512):
    """Largest divisor TH of H with TH*W <= target_rows and TH*W % 8 == 0.

    Prefer TH < H so the row-block grid axis is non-degenerate (more pipeline
    steps, megacore sharding). Falls back to the whole image.
    """
    divs = [th for th in range(1, H + 1) if H % th == 0]
    ok = [th for th in divs if th * W <= target_rows and (th * W) % 8 == 0]
    if not ok:
        return H
    pref = [th for th in ok if th < H] or ok
    return max(pref)


def hsc_forward(x_nchw, gwc_weight, pwc_weight, groups):
    """HSC forward: gwc(x) + pwc(x).

    x_nchw:     (N, Cin, H, W)
    gwc_weight: (Cout, Cin // groups, 3, 3)   (PyTorch OIHW, grouped)
    pwc_weight: (Cout, Cin, 1, 1)             (PyTorch OIHW)
    returns:    (N, Cout, H, W)
    """
    N, Cin, H, W = x_nchw.shape
    Cout = gwc_weight.shape[0]
    cin_g = Cin // groups
    cout_g = Cout // groups

    # NCHW -> NHWC, spatial zero-pad for the 3x3 conv (padding=1).
    x = jnp.transpose(x_nchw, (0, 2, 3, 1))
    xp = jnp.pad(x, ((0, 0), (1, 1), (1, 1), (0, 0)))

    # Expand grouped conv weight to dense block-diagonal (3, 3, Cin, Cout).
    w_dense = jnp.zeros((3, 3, Cin, Cout), dtype=x.dtype)
    for g in range(groups):
        blk = jnp.transpose(
            gwc_weight[g * cout_g:(g + 1) * cout_g], (2, 3, 1, 0)).astype(x.dtype)
        w_dense = w_dense.at[:, :,
                             g * cin_g:(g + 1) * cin_g,
                             g * cout_g:(g + 1) * cout_g].set(blk)

    # Fold the 1x1 pointwise conv into the centre 3x3 tap (identical math).
    w1 = jnp.transpose(pwc_weight[:, :, 0, 0], (1, 0)).astype(x.dtype)  # (Cin, Cout)
    w_dense = w_dense.at[1, 1].add(w1)

    # im2col weight; pad Cout up to a multiple of 128 for lane-dense output.
    w_im2col = w_dense.reshape(9 * Cin, Cout)
    Cout_p = max(128, ((Cout + 127) // 128) * 128)
    if Cout_p != Cout:
        w_im2col = jnp.pad(w_im2col, ((0, 0), (0, Cout_p - Cout)))

    TH = _pick_row_tile(H, W)
    NB = H // TH
    itemsize = np.dtype(x.dtype).itemsize

    cost = pl.CostEstimate(
        flops=2 * N * H * W * (9 * Cin) * Cout_p,
        transcendentals=0,
        bytes_accessed=(xp.size + w_im2col.size + N * H * W * Cout_p) * itemsize)

    out_flat = pl.pallas_call(
        hsc_kernel,
        out_shape=jax.ShapeDtypeStruct((N, H * W, Cout_p), x.dtype),
        grid_spec=pltpu.PrefetchScalarGridSpec(
            num_scalar_prefetch=0,
            grid=(N, NB),
            in_specs=[
                # Full padded image per batch element; block index constant in
                # j so it is DMA'd once per image, not per row block.
                pl.BlockSpec((1, H + 2, W + 2, Cin), lambda n, j: (n, 0, 0, 0)),
                # Constant weights, resident across the whole grid.
                pl.BlockSpec((9 * Cin, Cout_p), lambda n, j: (0, 0)),
            ],
            out_specs=pl.BlockSpec((1, TH * W, Cout_p), lambda n, j: (n, j, 0)),
            scratch_shapes=[pltpu.VMEM((TH * W, 9 * Cin), x.dtype)],
        ),
        compiler_params=pltpu.CompilerParams(
            dimension_semantics=("parallel", "parallel")),
        cost_estimate=cost,
    )(xp, w_im2col)

    out = out_flat.reshape(N, H, W, Cout_p)[..., :Cout]
    # NHWC -> NCHW to match PyTorch output layout.
    return jnp.transpose(out, (0, 3, 1, 2))


def hsc_reference(x_nchw, gwc_weight, pwc_weight, groups):
    """Pure-JAX reference (lax.conv) for correctness checking."""
    gwc = jax.lax.conv_general_dilated(
        x_nchw, gwc_weight, window_strides=(1, 1),
        padding=((1, 1), (1, 1)),
        dimension_numbers=("NCHW", "OIHW", "NCHW"),
        feature_group_count=groups)
    pwc = jax.lax.conv_general_dilated(
        x_nchw, pwc_weight, window_strides=(1, 1),
        padding=((0, 0), (0, 0)),
        dimension_numbers=("NCHW", "OIHW", "NCHW"))
    return gwc + pwc


if __name__ == "__main__":
    # Small, deterministic problem consistent with HSC(in_channels=4,
    # out_channels=8, p=2) on a (2, 4, 16, 16) NCHW input.
    N, Cin, Cout, H, W, P = 2, 4, 8, 16, 16, 2

    key = jax.random.PRNGKey(0)
    kx, kg, kp = jax.random.split(key, 3)

    x = jax.random.normal(kx, (N, Cin, H, W), dtype=jnp.float32)

    # Deterministic "kaiming-like" init matching nn.Conv2d weight shapes.
    gwc_fan_in = (Cin // P) * 3 * 3
    pwc_fan_in = Cin * 1 * 1
    gwc_w = jax.random.normal(kg, (Cout, Cin // P, 3, 3), dtype=jnp.float32) \
        * (1.0 / np.sqrt(gwc_fan_in))
    pwc_w = jax.random.normal(kp, (Cout, Cin, 1, 1), dtype=jnp.float32) \
        * (1.0 / np.sqrt(pwc_fan_in))

    out = jax.block_until_ready(hsc_forward(x, gwc_w, pwc_w, P))
    ref = jax.block_until_ready(hsc_reference(x, gwc_w, pwc_w, P))

    assert out.shape == (N, Cout, H, W), out.shape
    np.testing.assert_allclose(np.asarray(out), np.asarray(ref),
                               rtol=1e-3, atol=1e-3)

    print("KERNEL_OK")
</pallas_src>

<mosaic_0001>
module attributes {stable_mosaic.version = 11 : i64} {
  func.func @hsc_kernel(%arg0: i32, %arg1: i32, %arg2: memref<1x18x18x4xf32, #tpu.memory_space<vmem>>, %arg3: memref<36x128xf32, #tpu.memory_space<vmem>>, %arg4: memref<1x128x128xf32, #tpu.memory_space<vmem>>, %arg5: memref<128x36xf32, #tpu.memory_space<vmem>>) attributes {dimension_semantics = [#tpu.dimension_semantics<parallel>, #tpu.dimension_semantics<parallel>], iteration_bounds = array<i64: 2, 2>, scalar_prefetch = 0 : i64, scratch_operands = 1 : i64, tpu.core_type = #tpu.core_type<tc>, window_params = [{transform_indices = @transform_0, window_bounds = array<i64: 1, 18, 18, 4>}, {pipeline_mode = #tpu.pipeline_mode<synchronous>, transform_indices = @transform_1, window_bounds = array<i64: 36, 128>}, {transform_indices = @transform_2, window_bounds = array<i64: 1, 128, 128>}]} {
    %c8_i32 = arith.constant 8 : i32
    %0 = arith.muli %arg1, %c8_i32 : i32
    %c0_i32 = arith.constant 0 : i32
    %1 = arith.addi %0, %c0_i32 : i32
    %c0 = arith.constant 0 : index
    %2 = arith.index_cast %1 : i32 to index
    %c0_0 = arith.constant 0 : index
    %c0_1 = arith.constant 0 : index
    %3 = vector.load %arg2[%c0, %2, %c0_0, %c0_1] : memref<1x18x18x4xf32, #tpu.memory_space<vmem>>, vector<1x8x16x4xf32>
    %4 = vector.shape_cast %3 : vector<1x8x16x4xf32> to vector<8x16x4xf32>
    %5 = vector.shape_cast %4 : vector<8x16x4xf32> to vector<128x4xf32>
    %c0_2 = arith.constant 0 : index
    %c0_3 = arith.constant 0 : index
    %6 = vector.load %arg5[%c0_2, %c0_3] : memref<128x36xf32, #tpu.memory_space<vmem>>, vector<128x4xf32>
    tpu.vector_store %arg5[%c0_2, %c0_3], %5 {strides = array<i32>} : memref<128x36xf32, #tpu.memory_space<vmem>>, vector<128x4xf32>,
    %c0_i32_4 = arith.constant 0 : i32
    %7 = arith.addi %0, %c0_i32_4 : i32
    %c0_5 = arith.constant 0 : index
    %8 = arith.index_cast %7 : i32 to index
    %c1 = arith.constant 1 : index
    %c0_6 = arith.constant 0 : index
    %9 = vector.load %arg2[%c0_5, %8, %c1, %c0_6] : memref<1x18x18x4xf32, #tpu.memory_space<vmem>>, vector<1x8x16x4xf32>
    %10 = vector.shape_cast %9 : vector<1x8x16x4xf32> to vector<8x16x4xf32>
    %11 = vector.shape_cast %10 : vector<8x16x4xf32> to vector<128x4xf32>
    %c0_7 = arith.constant 0 : index
    %c4 = arith.constant 4 : index
    %12 = vector.load %arg5[%c0_7, %c4] : memref<128x36xf32, #tpu.memory_space<vmem>>, vector<128x4xf32>
    tpu.vector_store %arg5[%c0_7, %c4], %11 {strides = array<i32>} : memref<128x36xf32, #tpu.memory_space<vmem>>, vector<128x4xf32>,
    %c0_i32_8 = arith.constant 0 : i32
    %13 = arith.addi %0, %c0_i32_8 : i32
    %c0_9 = arith.constant 0 : index
    %14 = arith.index_cast %13 : i32 to index
    %c2 = arith.constant 2 : index
    %c0_10 = arith.constant 0 : index
    %15 = vector.load %arg2[%c0_9, %14, %c2, %c0_10] : memref<1x18x18x4xf32, #tpu.memory_space<vmem>>, vector<1x8x16x4xf32>
    %16 = vector.shape_cast %15 : vector<1x8x16x4xf32> to vector<8x16x4xf32>
    %17 = vector.shape_cast %16 : vector<8x16x4xf32> to vector<128x4xf32>
    %c0_11 = arith.constant 0 : index
    %c8 = arith.constant 8 : index
    %18 = vector.load %arg5[%c0_11, %c8] : memref<128x36xf32, #tpu.memory_space<vmem>>, vector<128x4xf32>
    tpu.vector_store %arg5[%c0_11, %c8], %17 {strides = array<i32>} : memref<128x36xf32, #tpu.memory_space<vmem>>, vector<128x4xf32>,
    %c1_i32 = arith.constant 1 : i32
    %19 = arith.addi %0, %c1_i32 : i32
    %c0_12 = arith.constant 0 : index
    %20 = arith.index_cast %19 : i32 to index
    %c0_13 = arith.constant 0 : index
    %c0_14 = arith.constant 0 : index
    %21 = vector.load %arg2[%c0_12, %20, %c0_13, %c0_14] : memref<1x18x18x4xf32, #tpu.memory_space<vmem>>, vector<1x8x16x4xf32>
    %22 = vector.shape_cast %21 : vector<1x8x16x4xf32> to vector<8x16x4xf32>
    %23 = vector.shape_cast %22 : vector<8x16x4xf32> to vector<128x4xf32>
    %c0_15 = arith.constant 0 : index
    %c12 = arith.constant 12 : index
    %24 = vector.load %arg5[%c0_15, %c12] : memref<128x36xf32, #tpu.memory_space<vmem>>, vector<128x4xf32>
    tpu.vector_store %arg5[%c0_15, %c12], %23 {strides = array<i32>} : memref<128x36xf32, #tpu.memory_space<vmem>>, vector<128x4xf32>,
    %c1_i32_16 = arith.constant 1 : i32
    %25 = arith.addi %0, %c1_i32_16 : i32
    %c0_17 = arith.constant 0 : index
    %26 = arith.index_cast %25 : i32 to index
    %c1_18 = arith.constant 1 : index
    %c0_19 = arith.constant 0 : index
    %27 = vector.load %arg2[%c0_17, %26, %c1_18, %c0_19] : memref<1x18x18x4xf32, #tpu.memory_space<vmem>>, vector<1x8x16x4xf32>
    %28 = vector.shape_cast %27 : vector<1x8x16x4xf32> to vector<8x16x4xf32>
    %29 = vector.shape_cast %28 : vector<8x16x4xf32> to vector<128x4xf32>
    %c0_20 = arith.constant 0 : index
    %c16 = arith.constant 16 : index
    %30 = vector.load %arg5[%c0_20, %c16] : memref<128x36xf32, #tpu.memory_space<vmem>>, vector<128x4xf32>
    tpu.vector_store %arg5[%c0_20, %c16], %29 {strides = array<i32>} : memref<128x36xf32, #tpu.memory_space<vmem>>, vector<128x4xf32>,
    %c1_i32_21 = arith.constant 1 : i32
    %31 = arith.addi %0, %c1_i32_21 : i32
    %c0_22 = arith.constant 0 : index
    %32 = arith.index_cast %31 : i32 to index
    %c2_23 = arith.constant 2 : index
    %c0_24 = arith.constant 0 : index
    %33 = vector.load %arg2[%c0_22, %32, %c2_23, %c0_24] : memref<1x18x18x4xf32, #tpu.memory_space<vmem>>, vector<1x8x16x4xf32>
    %34 = vector.shape_cast %33 : vector<1x8x16x4xf32> to vector<8x16x4xf32>
    %35 = vector.shape_cast %34 : vector<8x16x4xf32> to vector<128x4xf32>
    %c0_25 = arith.constant 0 : index
    %c20 = arith.constant 20 : index
    %36 = vector.load %arg5[%c0_25, %c20] : memref<128x36xf32, #tpu.memory_space<vmem>>, vector<128x4xf32>
    tpu.vector_store %arg5[%c0_25, %c20], %35 {strides = array<i32>} : memref<128x36xf32, #tpu.memory_space<vmem>>, vector<128x4xf32>,
    %c2_i32 = arith.constant 2 : i32
    %37 = arith.addi %0, %c2_i32 : i32
    %c0_26 = arith.constant 0 : index
    %38 = arith.index_cast %37 : i32 to index
    %c0_27 = arith.constant 0 : index
    %c0_28 = arith.constant 0 : index
    %39 = vector.load %arg2[%c0_26, %38, %c0_27, %c0_28] : memref<1x18x18x4xf32, #tpu.memory_space<vmem>>, vector<1x8x16x4xf32>
    %40 = vector.shape_cast %39 : vector<1x8x16x4xf32> to vector<8x16x4xf32>
    %41 = vector.shape_cast %40 : vector<8x16x4xf32> to vector<128x4xf32>
    %c0_29 = arith.constant 0 : index
    %c24 = arith.constant 24 : index
    %42 = vector.load %arg5[%c0_29, %c24] : memref<128x36xf32, #tpu.memory_space<vmem>>, vector<128x4xf32>
    tpu.vector_store %arg5[%c0_29, %c24], %41 {strides = array<i32>} : memref<128x36xf32, #tpu.memory_space<vmem>>, vector<128x4xf32>,
    %c2_i32_30 = arith.constant 2 : i32
    %43 = arith.addi %0, %c2_i32_30 : i32
    %c0_31 = arith.constant 0 : index
    %44 = arith.index_cast %43 : i32 to index
    %c1_32 = arith.constant 1 : index
    %c0_33 = arith.constant 0 : index
    %45 = vector.load %arg2[%c0_31, %44, %c1_32, %c0_33] : memref<1x18x18x4xf32, #tpu.memory_space<vmem>>, vector<1x8x16x4xf32>
    %46 = vector.shape_cast %45 : vector<1x8x16x4xf32> to vector<8x16x4xf32>
    %47 = vector.shape_cast %46 : vector<8x16x4xf32> to vector<128x4xf32>
    %c0_34 = arith.constant 0 : index
    %c28 = arith.constant 28 : index
    %48 = vector.load %arg5[%c0_34, %c28] : memref<128x36xf32, #tpu.memory_space<vmem>>, vector<128x4xf32>
    tpu.vector_store %arg5[%c0_34, %c28], %47 {strides = array<i32>} : memref<128x36xf32, #tpu.memory_space<vmem>>, vector<128x4xf32>,
    %c2_i32_35 = arith.constant 2 : i32
    %49 = arith.addi %0, %c2_i32_35 : i32
    %c0_36 = arith.constant 0 : index
    %50 = arith.index_cast %49 : i32 to index
    %c2_37 = arith.constant 2 : index
    %c0_38 = arith.constant 0 : index
    %51 = vector.load %arg2[%c0_36, %50, %c2_37, %c0_38] : memref<1x18x18x4xf32, #tpu.memory_space<vmem>>, vector<1x8x16x4xf32>
    %52 = vector.shape_cast %51 : vector<1x8x16x4xf32> to vector<8x16x4xf32>
    %53 = vector.shape_cast %52 : vector<8x16x4xf32> to vector<128x4xf32>
    %c0_39 = arith.constant 0 : index
    %c32 = arith.constant 32 : index
    %54 = vector.load %arg5[%c0_39, %c32] : memref<128x36xf32, #tpu.memory_space<vmem>>, vector<128x4xf32>
    tpu.vector_store %arg5[%c0_39, %c32], %53 {strides = array<i32>} : memref<128x36xf32, #tpu.memory_space<vmem>>, vector<128x4xf32>,
    %c0_40 = arith.constant 0 : index
    %c0_41 = arith.constant 0 : index
    %55 = vector.load %arg5[%c0_40, %c0_41] : memref<128x36xf32, #tpu.memory_space<vmem>>, vector<128x36xf32>
    %c0_42 = arith.constant 0 : index
    %c0_43 = arith.constant 0 : index
    %56 = vector.load %arg3[%c0_42, %c0_43] : memref<36x128xf32, #tpu.memory_space<vmem>>, vector<36x128xf32>
    %cst = arith.constant dense<0.000000e+00> : vector<128x128xf32>
    %57 = tpu.matmul %55, %56, %cst {dimension_numbers = #tpu.dot_dimension_numbers<[1], [0], [0], [1], [0, 0, 1, 1], [], []>} : vector<128x36xf32>, vector<36x128xf32>, vector<128x128xf32> -> vector<128x128xf32>
    %c0_44 = arith.constant 0 : index
    %c0_45 = arith.constant 0 : index
    %c0_46 = arith.constant 0 : index
    %58 = vector.load %arg4[%c0_44, %c0_45, %c0_46] : memref<1x128x128xf32, #tpu.memory_space<vmem>>, vector<1x128x128xf32>
    %59 = vector.shape_cast %58 : vector<1x128x128xf32> to vector<128x128xf32>
    %60 = vector.shape_cast %57 : vector<128x128xf32> to vector<1x128x128xf32>
    tpu.vector_store %arg4[%c0_44, %c0_45, %c0_46], %60 {strides = array<i32>} : memref<1x128x128xf32, #tpu.memory_space<vmem>>, vector<1x128x128xf32>,
    return
  }
  func.func @transform_0(%arg0: i32, %arg1: i32) -> (i32, i32, i32, i32) {
    %c0_i32 = arith.constant 0 : i32
    %c0_i32_0 = arith.constant 0 : i32
    %c0_i32_1 = arith.constant 0 : i32
    %c0_i32_2 = arith.constant 0 : i32
    return %arg0, %c0_i32, %c0_i32_0, %c0_i32_1 : i32, i32, i32, i32
  }
  func.func @transform_1(%arg0: i32, %arg1: i32) -> (i32, i32) {
    %c0_i32 = arith.constant 0 : i32
    %c0_i32_0 = arith.constant 0 : i32
    %c0_i32_1 = arith.constant 0 : i32
    return %c0_i32, %c0_i32_0 : i32, i32
  }
  func.func @transform_2(%arg0: i32, %arg1: i32) -> (i32, i32, i32) {
    %c0_i32 = arith.constant 0 : i32
    %c0_i32_0 = arith.constant 0 : i32
    return %arg0, %arg1, %c0_i32 : i32, i32, i32
  }
}

</mosaic_0001>

<bundles_post_ra>
// kernel: tpu_custom_call.1
= control target key start
LH: loop header
LB: loop body
LE: loop exit
PB: predicated region body
PF: predicated region fallthrough
CT: control target
= control target key end

     0   :  { %7 = vsyncpa [#allocation4], 0  ;;  %s2343_s0 = inlined_call_operand.vmem [shape: f32[2,18,18,4], index: 0, kind: input, shape index: {}]   ;;  %s2344_s1 = inlined_call_operand.vmem [shape: f32[36,128], index: 1, kind: input, shape index: {}]   ;;  %s2345_s2 = inlined_call_operand.hbm [shape: f32[2,256,128], index: 2, kind: output, shape index: {}]  }
   0x1   :  { %9 = vsyncpa [#allocation4 + $0x1], 0  ;;  %s1715_s9 = smov 0   ;;  %s1717_s10 = smov 0  }
   0x2   :  { %s1719_s11 = smov 0   ;;  %s1721_s12 = smov 0  }
   0x3   :  { %s1723_s13 = smov 0   ;;  %s1725_s14 = smov 0  }
   0x4   :  { %s1727_s15 = smov 0   ;;  %s1729_s16 = smov 0  }
   0x5 LB: > { %s1312_s17 = sadd.s32 4294967295, %s1688_s16   ;;  %s1313_s18 = sadd.s32 4294967294, %s1688_s16   ;;  %s1688_s16 = sphi %s1729_s16, %s15_s16   ;;  %s1684_s15 = sphi %s1727_s15, %s2354_s15   ;;  %s1680_s14 = sphi %s1725_s14, %s2353_s14   ;;  %s1676_s13 = sphi %s1723_s13, %s2352_s13   ;;  %s1672_s12 = sphi %s1721_s12, %s2351_s12   ;;  %s1668_s11 = sphi %s1719_s11, %s2350_s11   ;;  %s1664_s10 = sphi %s1717_s10, %s2349_s10   ;;  %s1660_s9 = sphi %s1715_s9, %s2348_s9  }
   0x6   : > { %s24_s19 = sadd.s32 1, %s1680_s14  ;;  %s27_s20 = sadd.s32 1, %s1684_s15 }
   0x7   : > { %p25_p0 = scmp.ge.s32.totalorder %s24_s19, 2  ;;  %p93_p1 = scmp.ne.s32.totalorder %s1668_s11, %s1664_s10 }
   0x8   : > { %p94_p2 = scmp.eq.s32.totalorder %s1312_s17, 3  ;;  %p99_p5 = scmp.ne.s32.totalorder %s1664_s10, %s1660_s9 }
   0x9   : > { %s2356_s19 = smov (%p25_p0, %s24_s19), 0  ;;  %s2358_s20 = smov (!%p25_p0, %s27_s20), %s1684_s15 }
   0xa   : > { %s79_s21 = ssub.s32 %s1680_s14, %s2356_s19  ;;  %p1766_p3 = por %p94_p2, %p93_p1 }
   0xb   : > { %p29_p4 = scmp.ge.s32.totalorder %s2358_s20, 2  ;;  %p100_p6 = scmp.eq.s32.totalorder %s1313_s18, 3 }
   0xc   : > { %p1316_p7 = scmp.ge.s32.totalorder %s1688_s16, 1  ;;  %p129_p9 = scmp.lt.s32.totalorder %s1688_s16, 5 }
   0xd   : > { %s2360_s20 = smov (%p29_p4, %s2358_s20), 0  ;;  %p1775_p8 = por %p100_p6, %p99_p5 }
   0xe   : > { %s78_s24 = ssub.s32 %s1684_s15, %s2360_s20  ;;  %s83_s25 = sadd.s32 1, %s1668_s11 }
   0xf   : > { %s80_s26 = sor.u32 %s79_s21, %s78_s24  ;;  %p130_p10 = pnand %p1316_p7, %p129_p9 }
  0x10   : > { %p81_p11 = scmp.eq.s32.totalorder %s80_s26, 0  ;;  %p151_p12 = scmp.lt.s32.totalorder (!%p130_p10), %s1676_s13, 1  ;;  %vm176_vm0 = vcmask (!%p130_p10), 31744   ;;  %v991_v38 = vld [vmem:[%s2344_s1] sm:$0xff] (!%p130_p10)  ;;  %v992_v39 = vld [vmem:[%s2344_s1 + $0x8] sm:$0xff] (!%p130_p10)  ;;  %v993_v41 = vld [vmem:[%s2344_s1 + $0x10] sm:$0xff] (!%p130_p10) }
  0x11   : > { %133 = sbr.rel (%p130_p10) target bundleno = 635 (0x27b), region = 28  ;;  %s1690_s7 = smov (!%p130_p10), 4   ;;  %v1499_v40 = vpack.c.bf16 (!%p130_p10), %v992_v39, %v991_v38  ;;  %v994_v42 = vld [vmem:[%s2344_s1 + $0x18] sm:$0xff] (!%p130_p10)  ;;  %v995_v44 = vld [vmem:[%s2344_s1 + $0x20] sm:$0xf] (!%p130_p10)  ;;  %vm1045_vm1 = vcmask (!%p130_p10), 1043456  }
  0x12   : > { %s1784_s27 = scalar_select %p81_p11, %s1668_s11, %s83_s25  }
  0x13   : > { %s1320_s29 = smul.u32 (!%p130_p10), 192, %s1672_s12  ;;  %s1691_s8 = smov (!%p130_p10), 8   ;;  %1500 = vmatprep.subr.bf16.mxu0 (!%p130_p10), %v1499_v40  ;;  %1507 = vmatprep.subr.bf16.mxu1 (!%p130_p10), %v1499_v40  ;;  %v1503_v43 = vpack.c.bf16 (!%p130_p10), %v994_v42, %v993_v41  ;;  %vm273_vm2 = vcmask (!%p130_p10), 64544   ;;  %vm370_vm3 = vcmask (!%p130_p10), 97344   ;;  %vm470_vm4 = vcmask (!%p130_p10), 130144  }
  0x14   : > { %s1692_s17 = smov (!%p130_p10), 12   ;;  %s1693_s18 = smov (!%p130_p10), 16   ;;  %1502 = vmatpush3.bf16.msra.mxu0 (!%p130_p10), %v1499_v40  ;;  %1510 = vmatpush3.bf16.msra.mxu1 (!%p130_p10), %v1499_v40  ;;  %vm567_vm5 = vcmask (!%p130_p10), 162944   ;;  %vm664_vm6 = vcmask (!%p130_p10), 195744   ;;  %vm764_vm7 = vcmask (!%p130_p10), 228544   ;;  %vm861_vm8 = vcmask (!%p130_p10), 261344  }
  0x15   : > { %s1694_s21 = smov (!%p130_p10), 20   ;;  %s1695_s24 = smov (!%p130_p10), 24   ;;  %1504 = vmatprep.subr.bf16.mxu0 (!%p130_p10), %v1503_v43  ;;  %1508 = vmatprep.subr.bf16.mxu1 (!%p130_p10), %v1503_v43  ;;  %vm958_vm9 = vcmask (!%p130_p10), 294144   ;;  %vm996_vm10 = vcmask (!%p130_p10), 293888  }
  0x16   : > { %s1696_s25 = smov (!%p130_p10), 28   ;;  %s1697_s3 = smov (!%p130_p10), 32  }
  0x18   : > { %s152_s28 = scalar_select %p151_p12, %s1676_s13, 1  ;;  %1506 = vmatpush3.bf16.msra.mxu0 %v1503_v43  ;;  %1511 = vmatpush3.bf16.msra.mxu1 %v1503_v43 }
  0x19   : > { %1473 = vmatprep.subr.msk.mxu0 %vm1045_vm1, %v995_v44  ;;  %1509 = vmatprep.subr.msk.mxu1 %vm1045_vm1, %v995_v44 }
  0x1a   : > { %s1513_s30 = smul.u32 432, %s152_s28  ;;  %s1698_s28 = smov [#allocation3]  }
  0x1c   : > { %s155_s5 = scalar_lea.vmem %s2343_s0, %s1513_s30  ;;  %1474 = vmatpush3.msk.msra.mxu0 %vm1045_vm1, %v995_v44  ;;  %1512 = vmatpush3.msk.msra.mxu1 %vm1045_vm1, %v995_v44 }
  0x1d   : > { %s1792_s6 = scalar_lea.vmem %s155_s5, %s1320_s29  ;;  %s1598_s29 = sshll.u32 %s1698_s28, 4  ;;  %s1599_s29 = int_to_ptr.vmem [resolvable:$false] %s1598_s29 }
  0x1e   : > { %v194_v0 = vld [vmem:[%s1792_s6 + $0x9] sm:$0xff]  ;;  %v193_v1 = vld [vmem:[%s1792_s6 + $0x1] sm:$0xff]  ;;  %v1805_v4 = vld [vmem:[%s1792_s6 + $0x78] sm:$0xff]  ;;  %s1600_s30 = scalar_lea.vmem %s1599_s29, 4096 }
  0x1f   : > { %227 = vrot.lane.b32.xlu1 %v194_v0, %s1690_s7  ;;  %225 = vrot.lane.b32.xlu0 %v193_v1, %s1690_s7  ;;  %v1799_v2 = vld [vmem:[%s1792_s6 + $0x69] sm:$0xff]  ;;  %v1802_v3 = vld [vmem:[%s1792_s6 + $0x61] sm:$0xff]  ;;  %187 = vst.msk [vmem:[#allocation2 + $0x50] sm:$0xff] %vm176_vm0, %v1805_v4 }
  0x20   : > { %v1323_v5 = vld [vmem:[%s1792_s6 + $0x18] sm:$0xff]  ;;  %v1809_v6 = vld [vmem:[%s1792_s6 + $0x80] sm:$0xff]  ;;  %v1827_v10 = vld [vmem:[%s1792_s6 + $0x90] sm:$0xff] }
  0x21   : > { %v1324_v7 = vld [vmem:[%s1792_s6 + $0x20] sm:$0xff]  ;;  %179 = vst.msk [vmem:[#allocation2 + $0x10] sm:$0xff] %vm176_vm0, %v1323_v5  ;;  %188 = vst.msk [vmem:[#allocation2 + $0x58] sm:$0xff] %vm176_vm0, %v1809_v6  ;;  %v1830_v11 = vld [vmem:[%s1792_s6 + $0x30] sm:$0xff] }
  0x22   : > { %180 = vst.msk [vmem:[#allocation2 + $0x18] sm:$0xff] %vm176_vm0, %v1324_v7  ;;  %v1823_v8 = vld [vmem:[%s1792_s6 + $0x62] sm:$0xff]  ;;  %v1833_v12 = vld [vmem:[%s1792_s6 + $0x98] sm:$0xff]  ;;  %189 = vst.msk [vmem:[#allocation2 + $0x60] sm:$0xff] %vm176_vm0, %v1827_v10 }
  0x23   : > { %243 = vrot.lane.b32.xlu1 %v1799_v2, %s1690_s7  ;;  %241 = vrot.lane.b32.xlu0 %v1802_v3, %s1690_s7  ;;  %v290_v9 = vld [vmem:[%s1792_s6 + $0x2] sm:$0xff]  ;;  %v1836_v13 = vld [vmem:[%s1792_s6 + $0x38] sm:$0xff]  ;;  %181 = vst.msk [vmem:[#allocation2 + $0x20] sm:$0xff] %vm176_vm0, %v1830_v11  ;;  %190 = vst.msk [vmem:[#allocation2 + $0x68] sm:$0xff] %vm176_vm0, %v1833_v12 }
  0x24   : > { %182 = vst.msk [vmem:[#allocation2 + $0x28] sm:$0xff] %vm176_vm0, %v1836_v13  ;;  %v1850_v14 = vld [vmem:[%s1792_s6 + $0x6a] sm:$0xff]  ;;  %v160_v17 = vld [vmem:[%s1792_s6] sm:$0xff]  ;;  %v1413_v36 = vld [vmem:[%s1792_s6 + $0x92] sm:$0xff] }
  0x25   : > { %v291_v15 = vld [vmem:[%s1792_s6 + $0xa] sm:$0xff]  ;;  %177 = vst.msk [vmem:[#allocation2] sm:$0xff] %vm176_vm0, %v160_v17  ;;  %v1870_v21 = vld [vmem:[%s1792_s6 + $0x60] sm:$0xff]  ;;  %v1405_v37 = vld [vmem:[%s1792_s6 + $0x32] sm:$0xff] }
  0x26   : > { %v161_v16 = vld [vmem:[%s1792_s6 + $0x8] sm:$0xff]  ;;  %185 = vst.msk [vmem:[#allocation2 + $0x40] sm:$0xff] %vm176_vm0, %v1870_v21  ;;  %v1881_v22 = vld [vmem:[%s1792_s6 + $0xb0] sm:$0xff]  ;;  %v1897_v24 = vld [vmem:[%s1792_s6 + $0x79] sm:$0xff] }
  0x27   : > { %338 = vrot.lane.b32.xlu1 %v1823_v8, %s1691_s8  ;;  %322 = vrot.lane.b32.xlu0 %v290_v9, %s1691_s8  ;;  %178 = vst.msk [vmem:[#allocation2 + $0x8] sm:$0xff] %vm176_vm0, %v161_v16  ;;  %v1857_v18 = vld [vmem:[%s1792_s6 + $0xa8] sm:$0xff]  ;;  %v1884_v23 = vld [vmem:[%s1792_s6 + $0x50] sm:$0xff]  ;;  %192 = vst.msk [vmem:[#allocation2 + $0x78] sm:$0xff] %vm176_vm0, %v1881_v22 }
  0x28   : > { %v1860_v19 = vld [vmem:[%s1792_s6 + $0x48] sm:$0xff]  ;;  %191 = vst.msk [vmem:[#allocation2 + $0x70] sm:$0xff] %vm176_vm0, %v1857_v18  ;;  %184 = vst.msk [vmem:[#allocation2 + $0x38] sm:$0xff] %vm176_vm0, %v1884_v23  ;;  %v1339_v25 = vld [vmem:[%s1792_s6 + $0x19] sm:$0xff] }
  0x29   : > { %v1867_v20 = vld [vmem:[%s1792_s6 + $0x68] sm:$0xff]  ;;  %183 = vst.msk [vmem:[#allocation2 + $0x30] sm:$0xff] %vm176_vm0, %v1860_v19  ;;  %v1914_v28 = vld [vmem:[%s1792_s6 + $0x7a] sm:$0xff]  ;;  %v1397_v32 = vld [vmem:[%s1792_s6 + $0x91] sm:$0xff] }
  0x2a   : > { %186 = vst.msk [vmem:[#allocation2 + $0x48] sm:$0xff] %vm176_vm0, %v1867_v20  ;;  %v1907_v26 = vld [vmem:[%s1792_s6 + $0x81] sm:$0xff]  ;;  %v1389_v33 = vld [vmem:[%s1792_s6 + $0x31] sm:$0xff]  ;;  %v1398_v34 = vld [vmem:[%s1792_s6 + $0x99] sm:$0xff] }
  0x2b   : > { %340 = vrot.lane.b32.xlu1 %v1850_v14, %s1691_s8  ;;  %324 = vrot.lane.b32.xlu0 %v291_v15, %s1691_s8  ;;  %v1340_v27 = vld [vmem:[%s1792_s6 + $0x21] sm:$0xff]  ;;  %v1390_v35 = vld [vmem:[%s1792_s6 + $0x39] sm:$0xff] }
  0x2c   : > { %v1355_v29 = vld [vmem:[%s1792_s6 + $0x1a] sm:$0xff]  ;;  %v1927_v30 = vld [vmem:[%s1792_s6 + $0x82] sm:$0xff]  ;;  %v1400_v63 = vld [vmem:[%s1792_s6 + $0xb1] sm:$0xff] }
  0x2d   : > { %v1356_v31 = vld [vmem:[%s1792_s6 + $0x22] sm:$0xff]  ;;  %v1414_v45 = vld [vmem:[%s1792_s6 + $0x9a] sm:$0xff]  ;;  %v1392_v0 = vld [vmem:[%s1792_s6 + $0x51] sm:$0xff] }
  0x2e   : > { %v1406_v46 = vld [vmem:[%s1792_s6 + $0x3a] sm:$0xff]  ;;  %v1399_v55 = vld [vmem:[%s1792_s6 + $0xa9] sm:$0xff] }
  0x2f   : > { %438 = vrot.lane.b32.xlu1 %v1805_v4, %s1692_s17  ;;  %422 = vrot.lane.b32.xlu0 %v1323_v5, %s1692_s17  ;;  %v1391_v56 = vld [vmem:[%s1792_s6 + $0x49] sm:$0xff] }
  0x30   : > { %v1407_v9 = vld [vmem:[%s1792_s6 + $0x4a] sm:$0xff] }
  0x31   : > { %v1386_v42 = vld [vmem:[%s1792_s6 + $0xc8] sm:$0xff] }
  0x33   : > { %440 = vrot.lane.b32.xlu1 %v1809_v6, %s1692_s17  ;;  %424 = vrot.lane.b32.xlu0 %v1324_v7, %s1692_s17  ;;  %v1415_v7 = vld [vmem:[%s1792_s6 + $0xaa] sm:$0xff] }
  0x37   : > { %535 = vrot.lane.b32.xlu1 %v1897_v24, %s1693_s18  ;;  %519 = vrot.lane.b32.xlu0 %v1339_v25, %s1693_s18 }
  0x3b   : > { %245 = vrot.lane.b32.xlu1 %v1897_v24, %s1690_s7  ;;  %229 = vrot.lane.b32.xlu0 %v1339_v25, %s1690_s7 }
  0x3f   : > { %537 = vrot.lane.b32.xlu1 %v1907_v26, %s1693_s18  ;;  %521 = vrot.lane.b32.xlu0 %v1340_v27, %s1693_s18 }
  0x43   : > { %632 = vrot.lane.b32.xlu1 %v1914_v28, %s1694_s21  ;;  %616 = vrot.lane.b32.xlu0 %v1355_v29, %s1694_s21 }
  0x47   : > { %247 = vrot.lane.b32.xlu1 %v1907_v26, %s1690_s7  ;;  %231 = vrot.lane.b32.xlu0 %v1340_v27, %s1690_s7 }
  0x4b   : > { %342 = vrot.lane.b32.xlu1 %v1914_v28, %s1691_s8  ;;  %326 = vrot.lane.b32.xlu0 %v1355_v29, %s1691_s8 }
  0x4f   : > { %634 = vrot.lane.b32.xlu1 %v1927_v30, %s1694_s21  ;;  %618 = vrot.lane.b32.xlu0 %v1356_v31, %s1694_s21 }
  0x53   : > { %732 = vrot.lane.b32.xlu1 %v1827_v10, %s1695_s24  ;;  %716 = vrot.lane.b32.xlu0 %v1830_v11, %s1695_s24 }
  0x57   : > { %344 = vrot.lane.b32.xlu1 %v1927_v30, %s1691_s8  ;;  %328 = vrot.lane.b32.xlu0 %v1356_v31, %s1691_s8 }
  0x5b   : > { %442 = vrot.lane.b32.xlu1 %v1827_v10, %s1692_s17  ;;  %426 = vrot.lane.b32.xlu0 %v1830_v11, %s1692_s17 }
  0x5f   : > { %734 = vrot.lane.b32.xlu1 %v1833_v12, %s1695_s24  ;;  %718 = vrot.lane.b32.xlu0 %v1836_v13, %s1695_s24 }
  0x63   : > { %829 = vrot.lane.b32.xlu1 %v1397_v32, %s1696_s25  ;;  %813 = vrot.lane.b32.xlu0 %v1389_v33, %s1696_s25 }
  0x67   : > { %444 = vrot.lane.b32.xlu1 %v1833_v12, %s1692_s17  ;;  %428 = vrot.lane.b32.xlu0 %v1836_v13, %s1692_s17 }
  0x6b   : > { %539 = vrot.lane.b32.xlu1 %v1397_v32, %s1693_s18  ;;  %523 = vrot.lane.b32.xlu0 %v1389_v33, %s1693_s18 }
  0x6f   : > { %831 = vrot.lane.b32.xlu1 %v1398_v34, %s1696_s25  ;;  %815 = vrot.lane.b32.xlu0 %v1390_v35, %s1696_s25 }
  0x73   : > { %926 = vrot.lane.b32.xlu1 %v1413_v36, %s1697_s3  ;;  %910 = vrot.lane.b32.xlu0 %v1405_v37, %s1697_s3 }
  0x77   : > { %249 = vrot.lane.b32.xlu1 %v1397_v32, %s1690_s7  ;;  %233 = vrot.lane.b32.xlu0 %v1389_v33, %s1690_s7 }
  0x7b   : > { %541 = vrot.lane.b32.xlu1 %v1398_v34, %s1693_s18  ;;  %525 = vrot.lane.b32.xlu0 %v1390_v35, %s1693_s18 }
  0x7f   : > { %636 = vrot.lane.b32.xlu1 %v1413_v36, %s1694_s21  ;;  %620 = vrot.lane.b32.xlu0 %v1405_v37, %s1694_s21 }
  0x83   : > { %928 = vrot.lane.b32.xlu1 %v1414_v45, %s1697_s3  ;;  %912 = vrot.lane.b32.xlu0 %v1406_v46, %s1697_s3 }
  0x87   : > { %251 = vrot.lane.b32.xlu1 %v1398_v34, %s1690_s7  ;;  %235 = vrot.lane.b32.xlu0 %v1390_v35, %s1690_s7  ;;  %v1385_v35 = vld [vmem:[%s1792_s6 + $0xc0] sm:$0xff] }
  0x8b   : > { %346 = vrot.lane.b32.xlu1 %v1413_v36, %s1691_s8  ;;  %330 = vrot.lane.b32.xlu0 %v1405_v37, %s1691_s8 }
  0x8f   : > { %638 = vrot.lane.b32.xlu1 %v1414_v45, %s1694_s21  ;;  %622 = vrot.lane.b32.xlu0 %v1406_v46, %s1694_s21 }
  0x91   : > { %v228_v47 = vpop.permute.xlu1 %227  ;;  %v226_v48 = vpop.permute.xlu0 %225 }
  0x92   : > { %275 = vst.msk [vmem:[#allocation2 + $0x8] sm:$0xff] %vm273_vm2, %v228_v47  ;;  %274 = vst.msk [vmem:[#allocation2] sm:$0xff] %vm273_vm2, %v226_v48 }
  0x93   : > { %736 = vrot.lane.b32.xlu1 %v1857_v18, %s1695_s24  ;;  %720 = vrot.lane.b32.xlu0 %v1860_v19, %s1695_s24 }
  0x95   : > { %v244_v49 = vpop.permute.xlu1 %243  ;;  %v242_v50 = vpop.permute.xlu0 %241 }
  0x96   : > { %283 = vst.msk [vmem:[#allocation2 + $0x48] sm:$0xff] %vm273_vm2, %v244_v49  ;;  %282 = vst.msk [vmem:[#allocation2 + $0x40] sm:$0xff] %vm273_vm2, %v242_v50 }
  0x97   : > { %348 = vrot.lane.b32.xlu1 %v1414_v45, %s1691_s8  ;;  %332 = vrot.lane.b32.xlu0 %v1406_v46, %s1691_s8  ;;  %v1401_v45 = vld [vmem:[%s1792_s6 + $0xc1] sm:$0xff] }
  0x99   : > { %v339_v51 = vpop.permute.xlu1 %338  ;;  %v323_v52 = vpop.permute.xlu0 %322 }
  0x9a   : > { %379 = vst.msk [vmem:[#allocation2 + $0x40] sm:$0xff] %vm370_vm3, %v339_v51  ;;  %371 = vst.msk [vmem:[#allocation2] sm:$0xff] %vm370_vm3, %v323_v52  ;;  %v1402_v51 = vld [vmem:[%s1792_s6 + $0xc9] sm:$0xff] }
  0x9b   : > { %446 = vrot.lane.b32.xlu1 %v1857_v18, %s1692_s17  ;;  %430 = vrot.lane.b32.xlu0 %v1860_v19, %s1692_s17  ;;  %v1416_v19 = vld [vmem:[%s1792_s6 + $0xb2] sm:$0xff] }
  0x9d   : > { %v341_v53 = vpop.permute.xlu1 %340  ;;  %v325_v54 = vpop.permute.xlu0 %324 }
  0x9e   : > { %380 = vst.msk [vmem:[#allocation2 + $0x48] sm:$0xff] %vm370_vm3, %v341_v53  ;;  %372 = vst.msk [vmem:[#allocation2 + $0x8] sm:$0xff] %vm370_vm3, %v325_v54 }
  0x9f   : > { %738 = vrot.lane.b32.xlu1 %v1881_v22, %s1695_s24  ;;  %722 = vrot.lane.b32.xlu0 %v1884_v23, %s1695_s24 }
  0xa1   : > { %v439_v57 = vpop.permute.xlu1 %438  ;;  %v423_v58 = vpop.permute.xlu0 %422 }
  0xa2   : > { %479 = vst.msk [vmem:[#allocation2 + $0x40] sm:$0xff] %vm470_vm4, %v439_v57  ;;  %471 = vst.msk [vmem:[#allocation2] sm:$0xff] %vm470_vm4, %v423_v58 }
  0xa3   : > { %833 = vrot.lane.b32.xlu1 %v1399_v55, %s1696_s25  ;;  %817 = vrot.lane.b32.xlu0 %v1391_v56, %s1696_s25 }
  0xa5   : > { %v441_v59 = vpop.permute.xlu1 %440  ;;  %v425_v60 = vpop.permute.xlu0 %424 }
  0xa6   : > { %480 = vst.msk [vmem:[#allocation2 + $0x48] sm:$0xff] %vm470_vm4, %v441_v59  ;;  %472 = vst.msk [vmem:[#allocation2 + $0x8] sm:$0xff] %vm470_vm4, %v425_v60 }
  0xa7   : > { %448 = vrot.lane.b32.xlu1 %v1881_v22, %s1692_s17  ;;  %432 = vrot.lane.b32.xlu0 %v1884_v23, %s1692_s17  ;;  %v1408_v22 = vld [vmem:[%s1792_s6 + $0x52] sm:$0xff] }
  0xa9   : > { %v536_v61 = vpop.permute.xlu1 %535  ;;  %v520_v62 = vpop.permute.xlu0 %519 }
  0xaa   : > { %576 = vst.msk [vmem:[#allocation2 + $0x40] sm:$0xff] %vm567_vm5, %v536_v61  ;;  %568 = vst.msk [vmem:[#allocation2] sm:$0xff] %vm567_vm5, %v520_v62  ;;  %v1418_v61 = vld [vmem:[%s1792_s6 + $0xca] sm:$0xff] }
  0xab   : > { %543 = vrot.lane.b32.xlu1 %v1399_v55, %s1693_s18  ;;  %527 = vrot.lane.b32.xlu0 %v1391_v56, %s1693_s18 }
  0xad   : > { %v246_v1 = vpop.permute.xlu1 %245  ;;  %v230_v5 = vpop.permute.xlu0 %229 }
  0xae   : > { %284 = vst.msk [vmem:[#allocation2 + $0x50] sm:$0xff] %vm273_vm2, %v246_v1  ;;  %276 = vst.msk [vmem:[#allocation2 + $0x10] sm:$0xff] %vm273_vm2, %v230_v5  ;;  %v1387_v5 = vld [vmem:[%s1792_s6 + $0xd8] sm:$0xff] }
  0xaf   : > { %835 = vrot.lane.b32.xlu1 %v1400_v63, %s1696_s25  ;;  %819 = vrot.lane.b32.xlu0 %v1392_v0, %s1696_s25 }
  0xb1   : > { %v538_v10 = vpop.permute.xlu1 %537  ;;  %v522_v11 = vpop.permute.xlu0 %521 }
  0xb2   : > { %577 = vst.msk [vmem:[#allocation2 + $0x48] sm:$0xff] %vm567_vm5, %v538_v10  ;;  %569 = vst.msk [vmem:[#allocation2 + $0x8] sm:$0xff] %vm567_vm5, %v522_v11  ;;  %v1388_v10 = vld [vmem:[%s1792_s6 + $0xe0] sm:$0xff] }
  0xb3   : > { %930 = vrot.lane.b32.xlu1 %v1415_v7, %s1697_s3  ;;  %914 = vrot.lane.b32.xlu0 %v1407_v9, %s1697_s3 }
  0xb5   : > { %v633_v12 = vpop.permute.xlu1 %632  ;;  %v617_v13 = vpop.permute.xlu0 %616 }
  0xb6   : > { %673 = vst.msk [vmem:[#allocation2 + $0x40] sm:$0xff] %vm664_vm6, %v633_v12  ;;  %665 = vst.msk [vmem:[#allocation2] sm:$0xff] %vm664_vm6, %v617_v13 }
  0xb7   : > { %253 = vrot.lane.b32.xlu1 %v1399_v55, %s1690_s7  ;;  %237 = vrot.lane.b32.xlu0 %v1391_v56, %s1690_s7 }
  0xb9   : > { %v248_v15 = vpop.permute.xlu1 %247  ;;  %v232_v16 = vpop.permute.xlu0 %231 }
  0xba   : > { %285 = vst.msk [vmem:[#allocation2 + $0x58] sm:$0xff] %vm273_vm2, %v248_v15  ;;  %277 = vst.msk [vmem:[#allocation2 + $0x18] sm:$0xff] %vm273_vm2, %v232_v16 }
  0xbb   : > { %545 = vrot.lane.b32.xlu1 %v1400_v63, %s1693_s18  ;;  %529 = vrot.lane.b32.xlu0 %v1392_v0, %s1693_s18 }
  0xbd   : > { %v343_v17 = vpop.permute.xlu1 %342  ;;  %v327_v18 = vpop.permute.xlu0 %326 }
  0xbe   : > { %381 = vst.msk [vmem:[#allocation2 + $0x50] sm:$0xff] %vm370_vm3, %v343_v17  ;;  %373 = vst.msk [vmem:[#allocation2 + $0x10] sm:$0xff] %vm370_vm3, %v327_v18 }
  0xbf   : > { %640 = vrot.lane.b32.xlu1 %v1415_v7, %s1694_s21  ;;  %624 = vrot.lane.b32.xlu0 %v1407_v9, %s1694_s21 }
  0xc1   : > { %v635_v23 = vpop.permute.xlu1 %634  ;;  %v619_v25 = vpop.permute.xlu0 %618 }
  0xc2   : > { %674 = vst.msk [vmem:[#allocation2 + $0x48] sm:$0xff] %vm664_vm6, %v635_v23  ;;  %666 = vst.msk [vmem:[#allocation2 + $0x8] sm:$0xff] %vm664_vm6, %v619_v25 }
  0xc3   : > { %932 = vrot.lane.b32.xlu1 %v1416_v19, %s1697_s3  ;;  %916 = vrot.lane.b32.xlu0 %v1408_v22, %s1697_s3 }
  0xc5   : > { %v733_v27 = vpop.permute.xlu1 %732  ;;  %v717_v29 = vpop.permute.xlu0 %716 }
  0xc6   : > { %773 = vst.msk [vmem:[#allocation2 + $0x40] sm:$0xff] %vm764_vm7, %v733_v27  ;;  %765 = vst.msk [vmem:[#allocation2] sm:$0xff] %vm764_vm7, %v717_v29 }
  0xc7   : > { %255 = vrot.lane.b32.xlu1 %v1400_v63, %s1690_s7  ;;  %239 = vrot.lane.b32.xlu0 %v1392_v0, %s1690_s7 }
  0xc9   : > { %v345_v31 = vpop.permute.xlu1 %344  ;;  %v329_v32 = vpop.permute.xlu0 %328 }
  0xca   : > { %382 = vst.msk [vmem:[#allocation2 + $0x58] sm:$0xff] %vm370_vm3, %v345_v31  ;;  %374 = vst.msk [vmem:[#allocation2 + $0x18] sm:$0xff] %vm370_vm3, %v329_v32 }
  0xcb   : > { %350 = vrot.lane.b32.xlu1 %v1415_v7, %s1691_s8  ;;  %334 = vrot.lane.b32.xlu0 %v1407_v9, %s1691_s8 }
  0xcd   : > { %v443_v33 = vpop.permute.xlu1 %442  ;;  %v427_v34 = vpop.permute.xlu0 %426 }
  0xce   : > { %481 = vst.msk [vmem:[#allocation2 + $0x50] sm:$0xff] %vm470_vm4, %v443_v33  ;;  %473 = vst.msk [vmem:[#allocation2 + $0x10] sm:$0xff] %vm470_vm4, %v427_v34 }
  0xcf   : > { %642 = vrot.lane.b32.xlu1 %v1416_v19, %s1694_s21  ;;  %626 = vrot.lane.b32.xlu0 %v1408_v22, %s1694_s21 }
  0xd1   : > { %v735_v36 = vpop.permute.xlu1 %734  ;;  %v719_v37 = vpop.permute.xlu0 %718 }
  0xd2   : > { %774 = vst.msk [vmem:[#allocation2 + $0x48] sm:$0xff] %vm764_vm7, %v735_v36  ;;  %766 = vst.msk [vmem:[#allocation2 + $0x8] sm:$0xff] %vm764_vm7, %v719_v37 }
  0xd3   : > { %740 = vrot.lane.b32.xlu1 %v1385_v35, %s1695_s24  ;;  %724 = vrot.lane.b32.xlu0 %v1870_v21, %s1695_s24 }
  0xd5   : > { %v830_v38 = vpop.permute.xlu1 %829  ;;  %v814_v39 = vpop.permute.xlu0 %813 }
  0xd6   : > { %870 = vst.msk [vmem:[#allocation2 + $0x40] sm:$0xff] %vm861_vm8, %v830_v38  ;;  %862 = vst.msk [vmem:[#allocation2] sm:$0xff] %vm861_vm8, %v814_v39 }
  0xd7   : > { %352 = vrot.lane.b32.xlu1 %v1416_v19, %s1691_s8  ;;  %336 = vrot.lane.b32.xlu0 %v1408_v22, %s1691_s8 }
  0xd9   : > { %v445_v40 = vpop.permute.xlu1 %444  ;;  %v429_v41 = vpop.permute.xlu0 %428 }
  0xda   : > { %482 = vst.msk [vmem:[#allocation2 + $0x58] sm:$0xff] %vm470_vm4, %v445_v40  ;;  %474 = vst.msk [vmem:[#allocation2 + $0x18] sm:$0xff] %vm470_vm4, %v429_v41 }
  0xdb   : > { %450 = vrot.lane.b32.xlu1 %v1385_v35, %s1692_s17  ;;  %434 = vrot.lane.b32.xlu0 %v1870_v21, %s1692_s17 }
  0xdd   : > { %v540_v43 = vpop.permute.xlu1 %539  ;;  %v524_v44 = vpop.permute.xlu0 %523 }
  0xde   : > { %578 = vst.msk [vmem:[#allocation2 + $0x50] sm:$0xff] %vm567_vm5, %v540_v43  ;;  %570 = vst.msk [vmem:[#allocation2 + $0x10] sm:$0xff] %vm567_vm5, %v524_v44 }
  0xdf   : > { %742 = vrot.lane.b32.xlu1 %v1386_v42, %s1695_s24  ;;  %726 = vrot.lane.b32.xlu0 %v1867_v20, %s1695_s24 }
  0xe1   : > { %v832_v46 = vpop.permute.xlu1 %831  ;;  %v816_v47 = vpop.permute.xlu0 %815 }
  0xe2   : > { %871 = vst.msk [vmem:[#allocation2 + $0x48] sm:$0xff] %vm861_vm8, %v832_v46  ;;  %863 = vst.msk [vmem:[#allocation2 + $0x8] sm:$0xff] %vm861_vm8, %v816_v47 }
  0xe3   : > { %837 = vrot.lane.b32.xlu1 %v1401_v45, %s1696_s25  ;;  %821 = vrot.lane.b32.xlu0 %v1802_v3, %s1696_s25 }
  0xe5   : > { %v927_v21 = vpop.permute.xlu1 %926  ;;  %v911_v48 = vpop.permute.xlu0 %910 }
  0xe6   : > { %967 = vst.msk [vmem:[#allocation2 + $0x40] sm:$0xff] %vm958_vm9, %v927_v21  ;;  %959 = vst.msk [vmem:[#allocation2] sm:$0xff] %vm958_vm9, %v911_v48 }
  0xe7   : > { %452 = vrot.lane.b32.xlu1 %v1386_v42, %s1692_s17  ;;  %436 = vrot.lane.b32.xlu0 %v1867_v20, %s1692_s17 }
  0xe9   : > { %v250_v49 = vpop.permute.xlu1 %249  ;;  %v234_v50 = vpop.permute.xlu0 %233 }
  0xea   : > { %286 = vst.msk [vmem:[#allocation2 + $0x60] sm:$0xff] %vm273_vm2, %v250_v49  ;;  %278 = vst.msk [vmem:[#allocation2 + $0x20] sm:$0xff] %vm273_vm2, %v234_v50 }
  0xeb   : > { %547 = vrot.lane.b32.xlu1 %v1401_v45, %s1693_s18  ;;  %531 = vrot.lane.b32.xlu0 %v1802_v3, %s1693_s18  ;;  %v1417_v3 = vld [vmem:[%s1792_s6 + $0xc2] sm:$0xff] }
  0xed   : > { %v542_v52 = vpop.permute.xlu1 %541  ;;  %v526_v53 = vpop.permute.xlu0 %525  ;;  %v975_v54 = vld [vmem:[#allocation2] sm:$0xff] }
  0xee   : > { %v983_v55 = vld [vmem:[#allocation2 + $0x40] sm:$0xff]  ;;  %579 = vst.msk [vmem:[#allocation2 + $0x58] sm:$0xff] %vm567_vm5, %v542_v52  ;;  %571 = vst.msk [vmem:[#allocation2 + $0x18] sm:$0xff] %vm567_vm5, %v526_v53  ;;  %1475 = vmatprep.mubr.msk.f32.mxu0 %vm996_vm10, %v975_v54 }
  0xef   : > { %1487 = vmatprep.mubr.msk.f32.mxu1 %vm996_vm10, %v983_v55  ;;  %839 = vrot.lane.b32.xlu1 %v1402_v51, %s1696_s25 }
  0xf0   : > { %823 = vrot.lane.b32.xlu0 %v1799_v2, %s1696_s25 }
  0xf1   : > { %v637_v20 = vpop.permute.xlu1 %636  ;;  %v621_v56 = vpop.permute.xlu0 %620 }
  0xf2   : > { %675 = vst.msk [vmem:[#allocation2 + $0x50] sm:$0xff] %vm664_vm6, %v637_v20  ;;  %667 = vst.msk [vmem:[#allocation2 + $0x10] sm:$0xff] %vm664_vm6, %v621_v56 }
  0xf3   : > { %934 = vrot.lane.b32.xlu1 %v1417_v3, %s1697_s3 }
  0xf4   : > { %918 = vrot.lane.b32.xlu0 %v1823_v8, %s1697_s3 }
  0xf5   : > { %v929_v57 = vpop.permute.xlu1 %928  ;;  %v913_v58 = vpop.permute.xlu0 %912 }
  0xf6   : > { %968 = vst.msk [vmem:[#allocation2 + $0x48] sm:$0xff] %vm958_vm9, %v929_v57  ;;  %960 = vst.msk [vmem:[#allocation2 + $0x8] sm:$0xff] %vm958_vm9, %v913_v58 }
  0xf7   : > { %549 = vrot.lane.b32.xlu1 %v1402_v51, %s1693_s18 }
  0xf8   : > { %533 = vrot.lane.b32.xlu0 %v1799_v2, %s1693_s18  ;;  %s1439_s18 = sshll.u32 %s1672_s12, 4 }
  0xf9   : > { %v252_v59 = vpop.permute.xlu1 %251  ;;  %v236_v60 = vpop.permute.xlu0 %235 }
  0xfa   : > { %287 = vst.msk [vmem:[#allocation2 + $0x68] sm:$0xff] %vm273_vm2, %v252_v59  ;;  %279 = vst.msk [vmem:[#allocation2 + $0x28] sm:$0xff] %vm273_vm2, %v236_v60 }
  0xfb   : > { %644 = vrot.lane.b32.xlu1 %v1417_v3, %s1694_s21 }
  0xfc   : > { %628 = vrot.lane.b32.xlu0 %v1823_v8, %s1694_s21 }
  0xfd   : > { %v347_v62 = vpop.permute.xlu1 %346  ;;  %v331_v63 = vpop.permute.xlu0 %330  ;;  %v976_v0 = vld [vmem:[#allocation2 + $0x8] sm:$0xff] }
  0xfe   : > { %v984_v1 = vld [vmem:[#allocation2 + $0x48] sm:$0xff]  ;;  %383 = vst.msk [vmem:[#allocation2 + $0x60] sm:$0xff] %vm370_vm3, %v347_v62  ;;  %375 = vst.msk [vmem:[#allocation2 + $0x20] sm:$0xff] %vm370_vm3, %v331_v63  ;;  %1476 = vmatmul.mubr.msk.f32.vlgmr.msra.gmra.mrb[0].mxu0 %vm996_vm10, %v976_v0 }
  0xff   : > { %1488 = vmatmul.mubr.msk.f32.vlgmr.msra.gmra.mrb[0].mxu1 %vm996_vm10, %v984_v1  ;;  %936 = vrot.lane.b32.xlu1 %v1418_v61, %s1697_s3 }
 0x100   : > { %920 = vrot.lane.b32.xlu0 %v1850_v14, %s1697_s3 }
 0x101   : > { %v639_v2 = vpop.permute.xlu1 %638  ;;  %v623_v8 = vpop.permute.xlu0 %622 }
 0x102   : > { %676 = vst.msk [vmem:[#allocation2 + $0x58] sm:$0xff] %vm664_vm6, %v639_v2  ;;  %668 = vst.msk [vmem:[#allocation2 + $0x18] sm:$0xff] %vm664_vm6, %v623_v8 }
 0x103   : > { %646 = vrot.lane.b32.xlu1 %v1418_v61, %s1694_s21 }
 0x104   : > { %630 = vrot.lane.b32.xlu0 %v1850_v14, %s1694_s21  ;;  %v1403_v14 = vld [vmem:[%s1792_s6 + $0xd9] sm:$0xff]  ;;  %s1440_s21 = sshll.u32 %s1676_s13, 5 }
 0x105   : > { %v737_v7 = vpop.permute.xlu1 %736  ;;  %v721_v9 = vpop.permute.xlu0 %720 }
 0x106   : > { %775 = vst.msk [vmem:[#allocation2 + $0x50] sm:$0xff] %vm764_vm7, %v737_v7  ;;  %767 = vst.msk [vmem:[#allocation2 + $0x10] sm:$0xff] %vm764_vm7, %v721_v9 }
 0x107   : > { %744 = vrot.lane.b32.xlu1 %v1387_v5, %s1695_s24 }
 0x108   : > { %728 = vrot.lane.b32.xlu0 %v1805_v4, %s1695_s24  ;;  %v1404_v4 = vld [vmem:[%s1792_s6 + $0xe1] sm:$0xff] }
 0x109   : > { %v349_v11 = vpop.permute.xlu1 %348  ;;  %v333_v12 = vpop.permute.xlu0 %332 }
 0x10a   : > { %384 = vst.msk [vmem:[#allocation2 + $0x68] sm:$0xff] %vm370_vm3, %v349_v11  ;;  %376 = vst.msk [vmem:[#allocation2 + $0x28] sm:$0xff] %vm370_vm3, %v333_v12 }
 0x10b   : > { %746 = vrot.lane.b32.xlu1 %v1388_v10, %s1695_s24 }
 0x10c   : > { %730 = vrot.lane.b32.xlu0 %v1809_v6, %s1695_s24  ;;  %v1419_v6 = vld [vmem:[%s1792_s6 + $0xda] sm:$0xff]  ;;  %s1223_s24 = sadd.s32 %s1440_s21, %s1439_s18 }
 0x10d   : > { %v447_v13 = vpop.permute.xlu1 %446  ;;  %v431_v15 = vpop.permute.xlu0 %430 }
 0x10e   : > { %483 = vst.msk [vmem:[#allocation2 + $0x60] sm:$0xff] %vm470_vm4, %v447_v13  ;;  %475 = vst.msk [vmem:[#allocation2 + $0x20] sm:$0xff] %vm470_vm4, %v431_v15 }
 0x10f   : > { %841 = vrot.lane.b32.xlu1 %v1403_v14, %s1696_s25 }
 0x110   : > { %825 = vrot.lane.b32.xlu0 %v1897_v24, %s1696_s25  ;;  %v1420_v24 = vld [vmem:[%s1792_s6 + $0xe2] sm:$0xff]  ;;  %s148_s6 = sand.u32 1, %s1664_s10  }
 0x111   : > { %v739_v16 = vpop.permute.xlu1 %738  ;;  %v723_v17 = vpop.permute.xlu0 %722  ;;  %s1317_s7 = sshll.u32 %s148_s6, 7  ;;  %s2290_s12 = scalar_lea.sflag [#allocation4], %s148_s6 }
 0x112   : > { %776 = vst.msk [vmem:[#allocation2 + $0x58] sm:$0xff] %vm764_vm7, %v739_v16  ;;  %768 = vst.msk [vmem:[#allocation2 + $0x18] sm:$0xff] %vm764_vm7, %v723_v17  ;;  %s2260_s17 = scalar_lea.vmem [#allocation3], %s1317_s7 }
 0x113   : > { %843 = vrot.lane.b32.xlu1 %v1404_v4, %s1696_s25 }
 0x114   : > { %827 = vrot.lane.b32.xlu0 %v1907_v26, %s1696_s25  ;;  %s1441_s25 = sshll.u32 %s1223_s24, 7 }
 0x115   : > { %v834_v18 = vpop.permute.xlu1 %833  ;;  %v818_v19 = vpop.permute.xlu0 %817  ;;  %s2280_s26 = scalar_lea.hbm %s2345_s2, %s1441_s25 }
 0x116   : > { %872 = vst.msk [vmem:[#allocation2 + $0x50] sm:$0xff] %vm861_vm8, %v834_v18  ;;  %864 = vst.msk [vmem:[#allocation2 + $0x10] sm:$0xff] %vm861_vm8, %v818_v19 }
 0x117   : > { %938 = vrot.lane.b32.xlu1 %v1419_v6, %s1697_s3 }
 0x118   : > { %922 = vrot.lane.b32.xlu0 %v1914_v28, %s1697_s3 }
 0x119   : > { %v449_v22 = vpop.permute.xlu1 %448  ;;  %v433_v23 = vpop.permute.xlu0 %432 }
 0x11a   : > { %484 = vst.msk [vmem:[#allocation2 + $0x68] sm:$0xff] %vm470_vm4, %v449_v22  ;;  %476 = vst.msk [vmem:[#allocation2 + $0x28] sm:$0xff] %vm470_vm4, %v433_v23 }
 0x11b   : > { %940 = vrot.lane.b32.xlu1 %v1420_v24, %s1697_s3 }
 0x11c   : > { %924 = vrot.lane.b32.xlu0 %v1927_v30, %s1697_s3  ;;  %s1226_s3 = sshll.u32 %s2260_s17, 4  ;;  %s2282_s3 = int_to_ptr.vmem [resolvable:$true] %s1226_s3 }
 0x11d   : > { %v544_v26 = vpop.permute.xlu1 %543  ;;  %v528_v25 = vpop.permute.xlu0 %527  ;;  %s1594_s13 = scalar_lea.vmem %s2282_s3, 2048  ;;  %p1601_p2 = scmp.lt.s32.totalorder %s2282_s3, %s1599_s29 }
 0x11e   : > { %580 = vst.msk [vmem:[#allocation2 + $0x60] sm:$0xff] %vm567_vm5, %v544_v26  ;;  %572 = vst.msk [vmem:[#allocation2 + $0x20] sm:$0xff] %vm567_vm5, %v528_v25  ;;  %p1595_p13 = scmp.ne.s32.totalorder %s2282_s3, %s1594_s13  ;;  %p1602_p4 = scmp.lt.s32.totalorder %s1600_s30, %s1594_s13 }
 0x120   : > { %p1596_p0 = pnand %p1595_p13, %p1766_p3  ;;  %p1603_p5 = por %p1602_p4, %p1601_p2 }
 0x121   : > { %v836_v27 = vpop.permute.xlu1 %835  ;;  %v820_v28 = vpop.permute.xlu0 %819 }
 0x122   : > { %873 = vst.msk [vmem:[#allocation2 + $0x58] sm:$0xff] %vm861_vm8, %v836_v27  ;;  %865 = vst.msk [vmem:[#allocation2 + $0x18] sm:$0xff] %vm861_vm8, %v820_v28  ;;  %p1597_p1 = pneg %p1596_p0 }
 0x124   : > { %p1604_p6 = pnand %p1603_p5, %p1597_p1 }
 0x125   : > { %v931_v29 = vpop.permute.xlu1 %930  ;;  %v915_v31 = vpop.permute.xlu0 %914 }
 0x126   : > { %969 = vst.msk [vmem:[#allocation2 + $0x50] sm:$0xff] %vm958_vm9, %v931_v29  ;;  %961 = vst.msk [vmem:[#allocation2 + $0x10] sm:$0xff] %vm958_vm9, %v915_v31 }
 0x129   : > { %v254_v32 = vpop.permute.xlu1 %253  ;;  %v238_v30 = vpop.permute.xlu0 %237 }
 0x12a   : > { %288 = vst.msk [vmem:[#allocation2 + $0x70] sm:$0xff] %vm273_vm2, %v254_v32  ;;  %280 = vst.msk [vmem:[#allocation2 + $0x30] sm:$0xff] %vm273_vm2, %v238_v30 }
 0x12d   : > { %v546_v33 = vpop.permute.xlu1 %545  ;;  %v530_v34 = vpop.permute.xlu0 %529  ;;  %v977_v35 = vld [vmem:[#allocation2 + $0x10] sm:$0xff] }
 0x12e   : > { %v985_v36 = vld [vmem:[#allocation2 + $0x50] sm:$0xff]  ;;  %581 = vst.msk [vmem:[#allocation2 + $0x68] sm:$0xff] %vm567_vm5, %v546_v33  ;;  %573 = vst.msk [vmem:[#allocation2 + $0x28] sm:$0xff] %vm567_vm5, %v530_v34  ;;  %1478 = vmatprep.mubr.msk.f32.mxu0 %vm996_vm10, %v977_v35 }
 0x12f   : > { %1490 = vmatprep.mubr.msk.f32.mxu1 %vm996_vm10, %v985_v36 }
 0x131   : > { %v641_v37 = vpop.permute.xlu1 %640  ;;  %v625_v38 = vpop.permute.xlu0 %624 }
 0x132   : > { %677 = vst.msk [vmem:[#allocation2 + $0x60] sm:$0xff] %vm664_vm6, %v641_v37  ;;  %669 = vst.msk [vmem:[#allocation2 + $0x20] sm:$0xff] %vm664_vm6, %v625_v38 }
 0x135   : > { %v933_v39 = vpop.permute.xlu1 %932  ;;  %v917_v40 = vpop.permute.xlu0 %916 }
 0x136   : > { %970 = vst.msk [vmem:[#allocation2 + $0x58] sm:$0xff] %vm958_vm9, %v933_v39  ;;  %962 = vst.msk [vmem:[#allocation2 + $0x18] sm:$0xff] %vm958_vm9, %v917_v40 }
 0x139   : > { %v256_v41 = vpop.permute.xlu1 %255  ;;  %v240_v42 = vpop.permute.xlu0 %239 }
 0x13a   : > { %289 = vst.msk [vmem:[#allocation2 + $0x78] sm:$0xff] %vm273_vm2, %v256_v41  ;;  %281 = vst.msk [vmem:[#allocation2 + $0x38] sm:$0xff] %vm273_vm2, %v240_v42 }
 0x13d   : > { %v351_v43 = vpop.permute.xlu1 %350  ;;  %v335_v44 = vpop.permute.xlu0 %334  ;;  %v978_v45 = vld [vmem:[#allocation2 + $0x18] sm:$0xff] }
 0x13e   : > { %v986_v46 = vld [vmem:[#allocation2 + $0x58] sm:$0xff]  ;;  %385 = vst.msk [vmem:[#allocation2 + $0x70] sm:$0xff] %vm370_vm3, %v351_v43  ;;  %377 = vst.msk [vmem:[#allocation2 + $0x30] sm:$0xff] %vm370_vm3, %v335_v44  ;;  %1479 = vmatmul.mubr.msk.f32.gmra.mrb[2].mxu0 %vm996_vm10, %v978_v45 }
 0x13f   : > { %1491 = vmatmul.mubr.msk.f32.gmra.mrb[2].mxu1 %vm996_vm10, %v986_v46 }
 0x141   : > { %v643_v47 = vpop.permute.xlu1 %642  ;;  %v627_v21 = vpop.permute.xlu0 %626 }
 0x142   : > { %678 = vst.msk [vmem:[#allocation2 + $0x68] sm:$0xff] %vm664_vm6, %v643_v47  ;;  %670 = vst.msk [vmem:[#allocation2 + $0x28] sm:$0xff] %vm664_vm6, %v627_v21 }
 0x145   : > { %v741_v48 = vpop.permute.xlu1 %740  ;;  %v725_v49 = vpop.permute.xlu0 %724 }
 0x146   : > { %777 = vst.msk [vmem:[#allocation2 + $0x60] sm:$0xff] %vm764_vm7, %v741_v48  ;;  %769 = vst.msk [vmem:[#allocation2 + $0x20] sm:$0xff] %vm764_vm7, %v725_v49 }
 0x149   : > { %v353_v50 = vpop.permute.xlu1 %352  ;;  %v337_v51 = vpop.permute.xlu0 %336 }
 0x14a   : > { %386 = vst.msk [vmem:[#allocation2 + $0x78] sm:$0xff] %vm370_vm3, %v353_v50  ;;  %378 = vst.msk [vmem:[#allocation2 + $0x38] sm:$0xff] %vm370_vm3, %v337_v51 }
 0x14d   : > { %v451_v52 = vpop.permute.xlu1 %450  ;;  %v435_v53 = vpop.permute.xlu0 %434 }
 0x14e   : > { %485 = vst.msk [vmem:[#allocation2 + $0x70] sm:$0xff] %vm470_vm4, %v451_v52  ;;  %477 = vst.msk [vmem:[#allocation2 + $0x30] sm:$0xff] %vm470_vm4, %v435_v53 }
 0x151   : > { %v743_v54 = vpop.permute.xlu1 %742  ;;  %v727_v55 = vpop.permute.xlu0 %726 }
 0x152   : > { %778 = vst.msk [vmem:[#allocation2 + $0x68] sm:$0xff] %vm764_vm7, %v743_v54  ;;  %770 = vst.msk [vmem:[#allocation2 + $0x28] sm:$0xff] %vm764_vm7, %v727_v55 }
 0x155   : > { %v838_v3 = vpop.permute.xlu1 %837  ;;  %v822_v20 = vpop.permute.xlu0 %821 }
 0x156   : > { %874 = vst.msk [vmem:[#allocation2 + $0x60] sm:$0xff] %vm861_vm8, %v838_v3  ;;  %866 = vst.msk [vmem:[#allocation2 + $0x20] sm:$0xff] %vm861_vm8, %v822_v20 }
 0x159   : > { %v453_v56 = vpop.permute.xlu1 %452  ;;  %v437_v57 = vpop.permute.xlu0 %436 }
 0x15a   : > { %486 = vst.msk [vmem:[#allocation2 + $0x78] sm:$0xff] %vm470_vm4, %v453_v56  ;;  %478 = vst.msk [vmem:[#allocation2 + $0x38] sm:$0xff] %vm470_vm4, %v437_v57 }
 0x15d   : > { %v548_v58 = vpop.permute.xlu1 %547  ;;  %v532_v59 = vpop.permute.xlu0 %531 }
 0x15e   : > { %582 = vst.msk [vmem:[#allocation2 + $0x70] sm:$0xff] %vm567_vm5, %v548_v58  ;;  %574 = vst.msk [vmem:[#allocation2 + $0x30] sm:$0xff] %vm567_vm5, %v532_v59 }
 0x161   : > { %v840_v60 = vpop.permute.xlu1 %839 }
 0x162   : > { %v824_v61 = vpop.permute.xlu0 %823  ;;  %875 = vst.msk [vmem:[#allocation2 + $0x68] sm:$0xff] %vm861_vm8, %v840_v60 }
 0x163   : > { %867 = vst.msk [vmem:[#allocation2 + $0x28] sm:$0xff] %vm861_vm8, %v824_v61 }
 0x165   : > { %v935_v62 = vpop.permute.xlu1 %934 }
 0x166   : > { %v919_v63 = vpop.permute.xlu0 %918  ;;  %971 = vst.msk [vmem:[#allocation2 + $0x60] sm:$0xff] %vm958_vm9, %v935_v62 }
 0x167   : > { %963 = vst.msk [vmem:[#allocation2 + $0x20] sm:$0xff] %vm958_vm9, %v919_v63 }
 0x169   : > { %v550_v0 = vpop.permute.xlu1 %549 }
 0x16a   : > { %v534_v1 = vpop.permute.xlu0 %533  ;;  %583 = vst.msk [vmem:[#allocation2 + $0x78] sm:$0xff] %vm567_vm5, %v550_v0 }
 0x16b   : > { %575 = vst.msk [vmem:[#allocation2 + $0x38] sm:$0xff] %vm567_vm5, %v534_v1 }
 0x16d   : > { %v645_v2 = vpop.permute.xlu1 %644  ;;  %v987_v7 = vld [vmem:[#allocation2 + $0x60] sm:$0xff] }
 0x16e   : > { %v629_v8 = vpop.permute.xlu0 %628  ;;  %v979_v5 = vld [vmem:[#allocation2 + $0x20] sm:$0xff]  ;;  %679 = vst.msk [vmem:[#allocation2 + $0x70] sm:$0xff] %vm664_vm6, %v645_v2  ;;  %1493 = vmatprep.mubr.msk.f32.mxu1 %vm996_vm10, %v987_v7 }
 0x16f   : > { %671 = vst.msk [vmem:[#allocation2 + $0x30] sm:$0xff] %vm664_vm6, %v629_v8  ;;  %1481 = vmatprep.mubr.msk.f32.mxu0 %vm996_vm10, %v979_v5 }
 0x171   : > { %v937_v9 = vpop.permute.xlu1 %936 }
 0x172   : > { %v921_v10 = vpop.permute.xlu0 %920  ;;  %972 = vst.msk [vmem:[#allocation2 + $0x68] sm:$0xff] %vm958_vm9, %v937_v9 }
 0x173   : > { %964 = vst.msk [vmem:[#allocation2 + $0x28] sm:$0xff] %vm958_vm9, %v921_v10 }
 0x175   : > { %v647_v11 = vpop.permute.xlu1 %646 }
 0x176   : > { %v631_v12 = vpop.permute.xlu0 %630  ;;  %680 = vst.msk [vmem:[#allocation2 + $0x78] sm:$0xff] %vm664_vm6, %v647_v11 }
 0x177   : > { %672 = vst.msk [vmem:[#allocation2 + $0x38] sm:$0xff] %vm664_vm6, %v631_v12 }
 0x179   : > { %v745_v14 = vpop.permute.xlu1 %744  ;;  %v988_v4 = vld [vmem:[#allocation2 + $0x68] sm:$0xff] }
 0x17a   : > { %v729_v13 = vpop.permute.xlu0 %728  ;;  %v980_v15 = vld [vmem:[#allocation2 + $0x28] sm:$0xff]  ;;  %779 = vst.msk [vmem:[#allocation2 + $0x70] sm:$0xff] %vm764_vm7, %v745_v14  ;;  %1494 = vmatmul.mubr.msk.f32.gmra.mrb[4].mxu1 %vm996_vm10, %v988_v4 }
 0x17b   : > { %771 = vst.msk [vmem:[#allocation2 + $0x30] sm:$0xff] %vm764_vm7, %v729_v13  ;;  %1482 = vmatmul.mubr.msk.f32.gmra.mrb[4].mxu0 %vm996_vm10, %v980_v15 }
 0x17d   : > { %v747_v16 = vpop.permute.xlu1 %746 }
 0x17e   : > { %v731_v17 = vpop.permute.xlu0 %730  ;;  %780 = vst.msk [vmem:[#allocation2 + $0x78] sm:$0xff] %vm764_vm7, %v747_v16 }
 0x17f   : > { %772 = vst.msk [vmem:[#allocation2 + $0x38] sm:$0xff] %vm764_vm7, %v731_v17 }
 0x181   : > { %v842_v6 = vpop.permute.xlu1 %841 }
 0x182   : > { %v826_v18 = vpop.permute.xlu0 %825  ;;  %876 = vst.msk [vmem:[#allocation2 + $0x70] sm:$0xff] %vm861_vm8, %v842_v6 }
 0x183   : > { %868 = vst.msk [vmem:[#allocation2 + $0x30] sm:$0xff] %vm861_vm8, %v826_v18 }
 0x185   : > { %v844_v19 = vpop.permute.xlu1 %843 }
 0x186   : > { %v828_v24 = vpop.permute.xlu0 %827  ;;  %877 = vst.msk [vmem:[#allocation2 + $0x78] sm:$0xff] %vm861_vm8, %v844_v19 }
 0x187   : > { %869 = vst.msk [vmem:[#allocation2 + $0x38] sm:$0xff] %vm861_vm8, %v828_v24 }
 0x189   : > { %v939_v22 = vpop.permute.xlu1 %938 }
 0x18a   : > { %v923_v23 = vpop.permute.xlu0 %922  ;;  %973 = vst.msk [vmem:[#allocation2 + $0x70] sm:$0xff] %vm958_vm9, %v939_v22 }
 0x18b   : > { %965 = vst.msk [vmem:[#allocation2 + $0x30] sm:$0xff] %vm958_vm9, %v923_v23 }
 0x18d   : > { %v941_v26 = vpop.permute.xlu1 %940 }
 0x18e   : > { %v925_v25 = vpop.permute.xlu0 %924  ;;  %974 = vst.msk [vmem:[#allocation2 + $0x78] sm:$0xff] %vm958_vm9, %v941_v26 }
 0x18f   : > { %966 = vst.msk [vmem:[#allocation2 + $0x38] sm:$0xff] %vm958_vm9, %v925_v25 }
 0x191   : > { %v989_v28 = vld [vmem:[#allocation2 + $0x70] sm:$0xff] }
 0x192   : > { %v981_v27 = vld [vmem:[#allocation2 + $0x30] sm:$0xff]  ;;  %1496 = vmatprep.mubr.msk.f32.mxu1 %vm996_vm10, %v989_v28 }
 0x193   : > { %1484 = vmatprep.mubr.msk.f32.mxu0 %vm996_vm10, %v981_v27 }
 0x195   : > { %v990_v31 = vld [vmem:[#allocation2 + $0x78] sm:$0xff] }
 0x196   : > { %v982_v29 = vld [vmem:[#allocation2 + $0x38] sm:$0xff]  ;;  %1497 = vmatmul.mubr.msk.f32.gmra.mrb[6].mxu1 %vm996_vm10, %v990_v31 }
 0x197   : > { %1485 = vmatmul.mubr.msk.f32.gmra.mrb[6].mxu0 %vm996_vm10, %v982_v29 }
 0x1d1   : > { %v1477_v32 = vpop.f32.mrb[0].mxu0 }
 0x1d2   : > { %v1489_v30 = vpop.f32.mrb[0].mxu1  ;;  %1195 = vst [vmem:[%s2260_s17 + $0x8] sm:$0xff] %v1477_v32  ;;  %v1115_v33 = vpop.f32.mrb[1].mxu0 }
 0x1d3   : > { %1203 = vst [vmem:[%s2260_s17 + $0x48] sm:$0xff] %v1489_v30  ;;  %v1155_v34 = vpop.f32.mrb[1].mxu1  ;;  %1194 = vst [vmem:[%s2260_s17] sm:$0xff] %v1115_v33 }
 0x1d4   : > { %1202 = vst [vmem:[%s2260_s17 + $0x40] sm:$0xff] %v1155_v34 }
 0x211   : > { %v1480_v35 = vpop.f32.mrb[2].mxu0 }
 0x212   : > { %v1492_v36 = vpop.f32.mrb[2].mxu1  ;;  %1197 = vst [vmem:[%s2260_s17 + $0x18] sm:$0xff] %v1480_v35  ;;  %v1125_v37 = vpop.f32.mrb[3].mxu0 }
 0x213   : > { %1205 = vst [vmem:[%s2260_s17 + $0x58] sm:$0xff] %v1492_v36  ;;  %v1165_v38 = vpop.f32.mrb[3].mxu1  ;;  %1196 = vst [vmem:[%s2260_s17 + $0x10] sm:$0xff] %v1125_v37 }
 0x214   : > { %1204 = vst [vmem:[%s2260_s17 + $0x50] sm:$0xff] %v1165_v38 }
 0x24d   : > { %v1495_v40 = vpop.f32.mrb[4].mxu1 }
 0x24e   : > { %v1483_v39 = vpop.f32.mrb[4].mxu0  ;;  %1207 = vst [vmem:[%s2260_s17 + $0x68] sm:$0xff] %v1495_v40  ;;  %v1175_v42 = vpop.f32.mrb[5].mxu1 }
 0x24f   : > { %1199 = vst [vmem:[%s2260_s17 + $0x28] sm:$0xff] %v1483_v39  ;;  %v1135_v41 = vpop.f32.mrb[5].mxu0  ;;  %1206 = vst [vmem:[%s2260_s17 + $0x60] sm:$0xff] %v1175_v42 }
 0x250   : > { %1198 = vst [vmem:[%s2260_s17 + $0x20] sm:$0xff] %v1135_v41 }
 0x269   : > { %v1498_v44 = vpop.f32.mrb[6].mxu1 }
 0x26a   : > { %v1486_v43 = vpop.f32.mrb[6].mxu0  ;;  %1209 = vst [vmem:[%s2260_s17 + $0x78] sm:$0xff] %v1498_v44  ;;  %v1185_v46 = vpop.f32.mrb[7].mxu1 }
 0x26b   : > { %1201 = vst [vmem:[%s2260_s17 + $0x38] sm:$0xff] %v1486_v43  ;;  %v1145_v45 = vpop.f32.mrb[7].mxu0  ;;  %1208 = vst [vmem:[%s2260_s17 + $0x70] sm:$0xff] %v1185_v46 }
 0x26c   : > { %1200 = vst [vmem:[%s2260_s17 + $0x30] sm:$0xff] %v1145_v45 }
 0x26d   : > { %1607 = shalt.err (!%p1604_p6)
}
 0x26e   : > { %s1608_s6 = scalar_lea.hbm %s2280_s26, 2048  ;;  %s1612_s18 = scalar_lea.hbm %s2345_s2, 8192 }
 0x26f   : > { %p1609_p7 = scmp.ne.s32.totalorder %s2280_s26, %s1608_s6  ;;  %p1613_p11 = scmp.lt.u32.totalorder %s2280_s26, %s2345_s2 }
 0x270   : > { %p1614_p12 = scmp.lt.u32.totalorder %s1612_s18, %s1608_s6  ;;  %p1616_p0 = scmp.lt.u32.totalorder %s1608_s6, %s2280_s26 }
 0x271   : > { %p1610_p9 = pnand %p1609_p7, %p1766_p3 }
 0x272   : > { %p1615_p13 = por %p1614_p12, %p1613_p11 }
 0x273   : > { %p1611_p10 = pneg %p1610_p9 }
 0x274   : > { %p1617_p1 = por %p1616_p0, %p1615_p13 }
 0x276   : > { %p1618_p2 = pnand %p1617_p1, %p1611_p10 }
 0x278   : > { %1621 = shalt.err (!%p1618_p2)
}
 0x279   : > { %s1699_s25 = smov 128  }
 0x27a   : > { %1514 = dma.vmem_to_hbm [thread:$0]  (%p1766_p3), %s2282_s3, 2048, %s2280_s26, %s2290_s12, %s1699_s25, %s1699_s25, %s1691_s8  }
 0x27b PF: > { %p1520_p4 = scmp.ge.s32.totalorder %s1688_s16, 2  ;;  %s1241_s4 = sand.u32 1, %s1660_s9  }
 0x27c   : > { %s1242_s5 = scalar_lea.sflag [#allocation4], %s1241_s4 }
 0x27d   : > { %p1517_p5 = pnand %p1520_p4, %p1775_p8 }
 0x27f   : > { %1655 = dma.done.wait (!%p1517_p5), %s1242_s5, 2048  }
 0x280   : > { %1657 = vsyncadd (!%p1517_p5), %s1242_s5, 4294965248  ;;  %s15_s16 = sadd.s32 1, %s1688_s16   ;;  %s2348_s9 = smov %s1664_s10 }
 0x281   : > { %p12_p6 = scmp.ge.s32.totalorder %s15_s16, 6   ;;  %s2349_s10 = smov %s1668_s11 }
 0x282   : > { %s2350_s11 = smov %s1784_s27  ;;  %s2351_s12 = smov %s1680_s14 }
 0x283   : > { %s2352_s13 = smov %s1684_s15  ;;  %s2353_s14 = smov %s2356_s19 }
 0x284   : > { %s2354_s15 = smov %s2360_s20  ;;  %14 = sbr.rel (!%p12_p6) target bundleno = 5 (0x5), region = 66 }
 0x28b   :  { %1247 = vsyncpa [#allocation4], 1 }
 0x28c   :  { %1249 = vsyncpa [#allocation4 + $0x1], 1 }

</bundles_post_ra>
